<compile_context>
chip_gen: v7x
topology: tpu7x:2x2x1
jax: 0.10.0
libtpu: 0.0.40
codegen_flags: <defaults>
</compile_context>

<pallas_src>
import functools

import jax
import jax.numpy as jnp
from jax.experimental import pallas as pl
from jax.experimental.pallas import tpu as pltpu


def two_layer_kernel(x_ref, w1_ref, w2_ref, b_ref, o_ref):
    # x_ref : (N, D_in)            bf16  (cast once in the wrapper)
    # w1_ref: (D_in, H_pad)        bf16  (pre-transposed + zero-padded, init time)
    # w2_ref: (H_pad, D_out_pad)   bf16  (pre-transposed + zero-padded, init time)
    # b_ref : (2, B_pad)           f32   (row 0 = b1 padded, row 1 = b2 padded)
    # o_ref : (N, D_out_pad)       f32   (lane-dense, unmasked full-width store)
    h_pad = w1_ref.shape[1]
    d_out_pad = w2_ref.shape[1]

    h = jnp.dot(x_ref[...], w1_ref[...], preferred_element_type=jnp.float32)
    h = jnp.maximum(h + b_ref[0:1, :h_pad], 0.0)            # f32 bias + ReLU (v5e-safe)
    y = jnp.dot(h.astype(jnp.bfloat16), w2_ref[...],
                preferred_element_type=jnp.float32)
    o_ref[...] = (y + b_ref[1:2, :d_out_pad]).astype(o_ref.dtype)


def prepare_params(w1, b1, w2, b2):
    """One-time parameter packing (NOT in the per-call forward path).

    Takes nn.Linear-layout params (w1: (H, D_in), w2: (D_out, H)) and returns
    kernel-ready params: transposed, bf16, H and D_out zero-padded to
    multiples of 128, biases packed into a single (2, B_pad) f32 array.
    Padded bias entries are exactly zero (required so padded hidden units stay
    zero through the ReLU).
    """
    H, D_in = w1.shape
    D_out = w2.shape[0]
    h_pad = pl.cdiv(H, 128) * 128
    d_out_pad = pl.cdiv(D_out, 128) * 128
    b_pad = max(h_pad, d_out_pad)

    w1_t = (jnp.zeros((D_in, h_pad), jnp.bfloat16)
            .at[:, :H].set(jnp.asarray(w1, jnp.bfloat16).T))          # (D_in, H_pad)
    w2_t = (jnp.zeros((h_pad, d_out_pad), jnp.bfloat16)
            .at[:H, :D_out].set(jnp.asarray(w2, jnp.bfloat16).T))     # (H_pad, D_out_pad)
    b_pack = (jnp.zeros((2, b_pad), jnp.float32)
              .at[0, :H].set(jnp.asarray(b1, jnp.float32))
              .at[1, :D_out].set(jnp.asarray(b2, jnp.float32)))       # (2, B_pad)
    return (w1_t, w2_t, b_pack), D_out


@functools.partial(jax.jit, static_argnames=("d_out",))
def two_layer_forward(x, w1_t, w2_t, b_pack, *, d_out):
    """x: (N, D_in) f32 (or bf16); params as produced by prepare_params."""
    N, D_in = x.shape
    h_pad = w1_t.shape[1]
    d_out_pad = w2_t.shape[1]

    # Cast once outside the kernel: drops a VPU pack op from the kernel and
    # halves the x HBM->VMEM DMA bytes.  No-op if the caller already feeds bf16.
    x_bf16 = x.astype(jnp.bfloat16)

    flops = 2 * N * (D_in * h_pad + h_pad * d_out_pad)
    bytes_accessed = (
        x_bf16.size * 2                       # bf16 activations
        + w1_t.size * 2 + w2_t.size * 2       # bf16 weights
        + b_pack.size * 4                     # f32 packed biases
        + N * d_out_pad * 4                   # f32 output writeback
    )

    out_pad = pl.pallas_call(
        two_layer_kernel,
        out_shape=jax.ShapeDtypeStruct((N, d_out_pad), jnp.float32),
        in_specs=[
            pl.BlockSpec(memory_space=pltpu.MemorySpace.VMEM),  # x (bf16)
            pl.BlockSpec(memory_space=pltpu.MemorySpace.VMEM),  # w1^T padded (bf16)
            pl.BlockSpec(memory_space=pltpu.MemorySpace.VMEM),  # w2^T padded (bf16)
            pl.BlockSpec(memory_space=pltpu.MemorySpace.VMEM),  # packed biases (f32)
        ],
        out_specs=pl.BlockSpec(memory_space=pltpu.MemorySpace.VMEM),
        cost_estimate=pl.CostEstimate(
            flops=flops, transcendentals=0, bytes_accessed=bytes_accessed),
    )(x_bf16, w1_t, w2_t, b_pack)

    return out_pad[:, :d_out]                 # cheap slice outside the kernel


if __name__ == "__main__":
    # Shapes implied by the module: x (N, D_in) -> (N, H) -> (N, D_out)
    N, D_in, H, D_out = 8, 32, 100, 16

    key = jax.random.PRNGKey(0)
    kx, k1, kb1, k2, kb2 = jax.random.split(key, 5)

    x = jax.random.normal(kx, (N, D_in), dtype=jnp.float32)

    # Deterministic parameter init (nn.Linear-style uniform bounds), in the
    # original nn.Linear layout: w1 (H, D_in), w2 (D_out, H).
    bound1 = 1.0 / (D_in ** 0.5)
    w1 = jax.random.uniform(k1, (H, D_in), jnp.float32, -bound1, bound1)
    b1 = jax.random.uniform(kb1, (H,), jnp.float32, -bound1, bound1)

    bound2 = 1.0 / (H ** 0.5)
    w2 = jax.random.uniform(k2, (D_out, H), jnp.float32, -bound2, bound2)
    b2 = jax.random.uniform(kb2, (D_out,), jnp.float32, -bound2, bound2)

    # One-time packing (transpose / bf16 cast / 128-padding / bias packing).
    (w1_t, w2_t, b_pack), d_out = prepare_params(w1, b1, w2, b2)

    out = two_layer_forward(x, w1_t, w2_t, b_pack, d_out=d_out)
    out = jax.block_until_ready(out)

    # Pure-JAX f32 reference of the forward semantics.  Tolerance is loosened
    # because the kernel's MXU operands are rounded to bf16 (f32 accumulate).
    ref = jnp.maximum(x @ w1.T + b1, 0.0) @ w2.T + b2
    assert out.shape == (N, D_out)
    assert jnp.allclose(out, ref, atol=5e-2, rtol=5e-2), float(jnp.max(jnp.abs(out - ref)))

    print("KERNEL_OK")
</pallas_src>

<mosaic_0001>
module attributes {stable_mosaic.version = 11 : i64} {
  func.func @two_layer_kernel(%arg0: memref<8x32xbf16, #tpu.memory_space<vmem>>, %arg1: memref<32x128xbf16, #tpu.memory_space<vmem>>, %arg2: memref<128x128xbf16, #tpu.memory_space<vmem>>, %arg3: memref<2x128xf32, #tpu.memory_space<vmem>>, %arg4: memref<8x128xf32, #tpu.memory_space<vmem>>) attributes {dimension_semantics = [], scalar_prefetch = 0 : i64, scratch_operands = 0 : i64, tpu.core_type = #tpu.core_type<tc>} {
    %c0 = arith.constant 0 : index
    %c0_0 = arith.constant 0 : index
    %0 = vector.load %arg0[%c0, %c0_0] : memref<8x32xbf16, #tpu.memory_space<vmem>>, vector<8x32xbf16>
    %c0_1 = arith.constant 0 : index
    %c0_2 = arith.constant 0 : index
    %1 = vector.load %arg1[%c0_1, %c0_2] : memref<32x128xbf16, #tpu.memory_space<vmem>>, vector<32x128xbf16>
    %cst = arith.constant dense<0.000000e+00> : vector<8x128xf32>
    %2 = tpu.matmul %0, %1, %cst {dimension_numbers = #tpu.dot_dimension_numbers<[1], [0], [0], [1], [0, 0, 1, 1], [], []>} : vector<8x32xbf16>, vector<32x128xbf16>, vector<8x128xf32> -> vector<8x128xf32>
    %c0_3 = arith.constant 0 : index
    %c0_4 = arith.constant 0 : index
    %3 = vector.load %arg3[%c0_3, %c0_4] : memref<2x128xf32, #tpu.memory_space<vmem>>, vector<1x128xf32>
    %4 = vector.broadcast %3 : vector<1x128xf32> to vector<8x128xf32>
    %5 = arith.addf %2, %4 : vector<8x128xf32>
    %cst_5 = arith.constant 0.000000e+00 : f32
    %6 = vector.broadcast %cst_5 : f32 to vector<8x128xf32>
    %7 = arith.maximumf %5, %6 : vector<8x128xf32>
    %8 = arith.truncf %7 : vector<8x128xf32> to vector<8x128xbf16>
    %c0_6 = arith.constant 0 : index
    %c0_7 = arith.constant 0 : index
    %9 = vector.load %arg2[%c0_6, %c0_7] : memref<128x128xbf16, #tpu.memory_space<vmem>>, vector<128x128xbf16>
    %cst_8 = arith.constant dense<0.000000e+00> : vector<8x128xf32>
    %10 = tpu.matmul %8, %9, %cst_8 {dimension_numbers = #tpu.dot_dimension_numbers<[1], [0], [0], [1], [0, 0, 1, 1], [], []>} : vector<8x128xbf16>, vector<128x128xbf16>, vector<8x128xf32> -> vector<8x128xf32>
    %c1 = arith.constant 1 : index
    %c0_9 = arith.constant 0 : index
    %11 = vector.load %arg3[%c1, %c0_9] : memref<2x128xf32, #tpu.memory_space<vmem>>, vector<1x128xf32>
    %12 = vector.broadcast %11 : vector<1x128xf32> to vector<8x128xf32>
    %13 = arith.addf %10, %12 : vector<8x128xf32>
    %c0_10 = arith.constant 0 : index
    %c0_11 = arith.constant 0 : index
    %14 = vector.load %arg4[%c0_10, %c0_11] : memref<8x128xf32, #tpu.memory_space<vmem>>, vector<8x128xf32>
    tpu.vector_store %arg4[%c0_10, %c0_11], %13 {strides = array<i32>} : memref<8x128xf32, #tpu.memory_space<vmem>>, vector<8x128xf32>,
    return
  }
}

</mosaic_0001>

<bundles_post_ra>
// kernel: two_layer_forward.1
= control target key start
LH: loop header
LB: loop body
LE: loop exit
PB: predicated region body
PF: predicated region fallthrough
CT: control target
= control target key end

     0   :  { %9 = vsyncpa [#allocation3], 0  ;;  %s460_s0 = inlined_call_operand.vmem [shape: bf16[8,32], index: 0, kind: input, shape index: {}]   ;;  %s461_s1 = inlined_call_operand.hbm [shape: bf16[32,128], index: 1, kind: input, shape index: {}]   ;;  %s462_s2 = inlined_call_operand.hbm [shape: bf16[128,128], index: 2, kind: input, shape index: {}]   ;;  %s463_s3 = inlined_call_operand.vmem [shape: f32[2,128], index: 3, kind: input, shape index: {}]   ;;  %s464_s4 = inlined_call_operand.hbm [shape: f32[8,128], index: 4, kind: output, shape index: {}]  }
   0x1   :  { %10 = vsyncpa [#allocation6], 0 }
   0x2   :  { %11 = vsyncpa [#allocation4], 0  ;;  %s383_s15 = smov [#allocation2]   ;;  %s311_s19 = scalar_lea.hbm %s461_s1, 256 }
   0x3   :  { %s19_s16 = sshll.u32 %s383_s15, 4  ;;  %p312_p0 = scmp.ne.s32.totalorder %s461_s1, %s311_s19  ;;  %s20_s16 = int_to_ptr.vmem [resolvable:$true] %s19_s16 }
   0x4   :  { %p315_p1 = scmp.lt.u32.totalorder %s311_s19, %s461_s1 }
   0x6   :  { %p317_p2 = pnand %p315_p1, %p312_p0 }
   0x8   :  { %320 = shalt.err (!%p317_p2)
}
   0x9   :  { %s321_s24 = scalar_lea.vmem %s20_s16, 256  ;;  %p326_p4 = scmp.lt.s32.totalorder %s20_s16, %s20_s16 }
   0xa   :  { %p322_p3 = scmp.ne.s32.totalorder %s20_s16, %s321_s24  ;;  %p327_p5 = scmp.lt.s32.totalorder %s321_s24, %s321_s24 }
   0xc   :  { %p328_p6 = por %p327_p5, %p326_p4 }
   0xe   :  { %p329_p7 = pnand %p328_p6, %p322_p3 }
  0x10   :  { %332 = shalt.err (!%p329_p7)
}
  0x11   :  { %s384_s25 = smov 64   ;;  %s385_s26 = smov 4  }
  0x12   :  { %25 = dma.hbm_to_vmem [thread:$0]  %s461_s1, 256, %s20_s16, [#allocation3], %s384_s25, %s384_s25, %s385_s26  }
  0x13   :  { %s386_s29 = smov [#allocation5]   ;;  %s333_s7 = scalar_lea.hbm %s462_s2, 1024 }
  0x14   :  { %s31_s30 = sshll.u32 %s386_s29, 4  ;;  %p334_p8 = scmp.ne.s32.totalorder %s462_s2, %s333_s7  ;;  %s32_s30 = int_to_ptr.vmem [resolvable:$true] %s31_s30 }
  0x15   :  { %p337_p9 = scmp.lt.u32.totalorder %s333_s7, %s462_s2 }
  0x17   :  { %p339_p10 = pnand %p337_p9, %p334_p8 }
  0x19   :  { %342 = shalt.err (!%p339_p10)
}
  0x1a   :  { %s343_s12 = scalar_lea.vmem %s32_s30, 1024  ;;  %p348_p12 = scmp.lt.s32.totalorder %s32_s30, %s32_s30 }
  0x1b   :  { %p344_p11 = scmp.ne.s32.totalorder %s32_s30, %s343_s12  ;;  %p349_p13 = scmp.lt.s32.totalorder %s343_s12, %s343_s12 }
  0x1d   :  { %p350_p0 = por %p349_p13, %p348_p12 }
  0x1f   :  { %p351_p1 = pnand %p350_p0, %p344_p11 }
  0x21   :  { %354 = shalt.err (!%p351_p1)
}
  0x22   :  { %37 = dma.hbm_to_vmem [thread:$0]  %s462_s2, 1024, %s32_s30, [#allocation6], %s384_s25, %s384_s25, %s385_s26  }
  0x23   :  { %377 = dma.done.wait [#allocation3], 256  }
  0x24   :  { %378 = vsyncadd [#allocation3], 4294967040 }
  0x25   :  { %379 = dma.done.wait [#allocation6], 1024  }
  0x26   :  { %380 = vsyncadd [#allocation6], 4294966272  ;;  %v387_v0 = vmov 0.0   ;;  %vm388_vm0 = vmmov 0   ;;  %v301_v1 = vld [vmem:[#allocation2] sm:$0xff]   ;;  %v302_v2 = vld [vmem:[#allocation2 + $0x8] sm:$0xff]  }
  0x27   :  { %266 = vmatprep.subr.bf16.mxu0 %v387_v0  ;;  %270 = vmatprep.mubr.msk.bf16.mxu0 %vm388_vm0, %v387_v0  ;;  %v303_v3 = vld [vmem:[#allocation5] sm:$0xff]   ;;  %vm69_vm1 = vcmask 261120   ;;  %v304_v4 = vld [vmem:[#allocation5 + $0x8] sm:$0xff]   ;;  %v305_v6 = vld [vmem:[#allocation5 + $0x10] sm:$0xff]   ;;  %s389_s18 = smov [#allocation7]  }
  0x28   :  { %274 = vmatprep.subr.bf16.mxu1 %v387_v0  ;;  %290 = vmatprep.mubr.msk.bf16.mxu1 %vm388_vm0, %v387_v0  ;;  %v47_v5 = vld [vmem:[%s460_s0] sm:$0xf]  ;;  %v306_v7 = vld [vmem:[#allocation5 + $0x18] sm:$0xff]   ;;  %v307_v8 = vld [vmem:[#allocation5 + $0x20] sm:$0xff]   ;;  %s231_s19 = sshll.u32 %s389_s18, 4  ;;  %s232_s19 = int_to_ptr.vmem [resolvable:$true] %s231_s19 }
  0x29   :  { %267 = vmatpush3.bf16.msra.mxu0 %v301_v1  ;;  %275 = vmatpush3.bf16.msra.mxu1 %v303_v3  ;;  %v308_v9 = vld [vmem:[#allocation5 + $0x28] sm:$0xff]   ;;  %v309_v10 = vld [vmem:[#allocation5 + $0x30] sm:$0xff]   ;;  %v310_v11 = vld [vmem:[#allocation5 + $0x38] sm:$0xff]   ;;  %s355_s20 = scalar_lea.vmem %s232_s19, 128  ;;  %p360_p3 = scmp.lt.s32.totalorder %s232_s19, %s232_s19 }
  0x2a   :  { %268 = vmatprep.subr.bf16.mxu0 %v387_v0  ;;  %276 = vmatprep.subr.bf16.mxu1 %v387_v0  ;;  %v241_v12 = vld [vmem:[%s463_s3] ss:$0 sm:$0xff]  ;;  %v245_v20 = vld [vmem:[%s463_s3 + $0x1] ss:$0 sm:$0xff]  ;;  %p356_p2 = scmp.ne.s32.totalorder %s232_s19, %s355_s20  ;;  %p361_p4 = scmp.lt.s32.totalorder %s355_s20, %s355_s20 }
  0x2c   :  { %p362_p5 = por %p361_p4, %p360_p3 }
  0x2d   :  { %269 = vmatpush3.bf16.msra.mxu0 %v302_v2  ;;  %277 = vmatpush3.bf16.msra.mxu1 %v304_v4 }
  0x2e   :  { %278 = vmatprep.subr.bf16.mxu1 %v387_v0  ;;  %p363_p6 = pnand %p362_p5, %p356_p2 }
  0x30   :  { %271 = vmatmul.mubr.msk.bf16.vlgmr.msra.gmra.mrb[0].mxu0 %vm69_vm1, %v47_v5 }
  0x31   :  { %279 = vmatpush3.bf16.msra.mxu1 %v305_v6 }
  0x32   :  { %280 = vmatprep.subr.bf16.mxu1 %v387_v0 }
  0x35   :  { %281 = vmatpush3.bf16.msra.mxu1 %v306_v7 }
  0x36   :  { %282 = vmatprep.subr.bf16.mxu1 %v387_v0 }
  0x39   :  { %283 = vmatpush3.bf16.msra.mxu1 %v307_v8 }
  0x3a   :  { %284 = vmatprep.subr.bf16.mxu1 %v387_v0 }
  0x3d   :  { %285 = vmatpush3.bf16.msra.mxu1 %v308_v9 }
  0x3e   :  { %286 = vmatprep.subr.bf16.mxu1 %v387_v0 }
  0x41   :  { %287 = vmatpush3.bf16.msra.mxu1 %v309_v10 }
  0x42   :  { %288 = vmatprep.subr.bf16.mxu1 %v387_v0 }
  0x45   :  { %289 = vmatpush3.bf16.msra.mxu1 %v310_v11 }
 0x103   :  { %v107_v13 = vpop.f32.mrb[0].mxu0 }
 0x104   :  { %v108_v14 = vadd.f32 %v241_v12, %v107_v13  ;;  %v272_v15 = vpop.f32.mrb[1].mxu0 }
 0x105   :  { %v110_v16 = vpop.f32.mrb[2].mxu0 }
 0x106   :  { %v113_v17 = vmax.f32 %v108_v14, 0.0  ;;  %v273_v18 = vpop.f32.mrb[3].mxu0 }
 0x108   :  { %v114_v19 = vpack.c.bf16 %v113_v17, %v113_v17 }
 0x10a   :  { %291 = vmatmul.mubr.bf16.vlgmr.msra.gmra.mrb[0].mxu1 %v114_v19 }
 0x1dd   :  { %v218_v21 = vpop.f32.mrb[0].mxu1 }
 0x1de   :  { %v219_v22 = vadd.f32 %v245_v20, %v218_v21  ;;  %v292_v23 = vpop.f32.mrb[1].mxu1 }
 0x1df   :  { %v221_v24 = vpop.f32.mrb[2].mxu1 }
 0x1e0   :  { %224 = vst [vmem:[#allocation7] sm:$0xff] %v219_v22  ;;  %v293_v25 = vpop.f32.mrb[3].mxu1 }
 0x1e1   :  { %366 = shalt.err (!%p363_p6)
}
 0x1e2   :  { %s367_s3 = scalar_lea.hbm %s464_s4, 128 }
 0x1e3   :  { %p368_p7 = scmp.ne.s32.totalorder %s464_s4, %s367_s3  ;;  %p371_p8 = scmp.lt.u32.totalorder %s367_s3, %s464_s4 }
 0x1e5   :  { %p373_p9 = pnand %p371_p8, %p368_p7 }
 0x1e7   :  { %376 = shalt.err (!%p373_p9)
}
 0x1e8   :  { %234 = dma.vmem_to_hbm [thread:$0]  %s232_s19, 128, %s464_s4, [#allocation4]  }
 0x1e9   :  { %381 = dma.done.wait [#allocation4], 128  }
 0x1ea   :  { %382 = vsyncadd [#allocation4], 4294967168 }
 0x1eb   :  { %238 = vsyncpa [#allocation3], 1 }
 0x1ec   :  { %239 = vsyncpa [#allocation6], 1 }
 0x1ed   :  { %240 = vsyncpa [#allocation4], 1 }

</bundles_post_ra>
